<compile_context>
chip_gen: v7x
topology: tpu7x:2x2x1
jax: 0.10.0
libtpu: 0.0.40
codegen_flags: <defaults>
</compile_context>

<pallas_src>
import math

import jax
import jax.numpy as jnp
from jax import lax
from jax.experimental import pallas as pl
from jax.experimental.pallas import tpu as pltpu


def _make_partial_kernel(class_num):
    """Accumulates the fused (2C,2C) Gram and per-class masses over batch tiles."""
    N2 = 2 * class_num
    # contract over the batch (lane) axis of both operands: (2C, tb) x (2C, tb) -> (2C, 2C)
    TN = (((1,), (1,)), ((), ()))

    def kernel(x_ref, gram_ref, sum_ref):
        b = pl.program_id(1)

        @pl.when(b == 0)
        def _init():
            gram_ref[...] = jnp.zeros_like(gram_ref)
            sum_ref[...] = jnp.zeros_like(sum_ref)

        x = x_ref[...]                                        # (2C, tb), native dtype
        # fused raw Gram over this batch tile (MXU, f32 accumulation)
        gram_ref[...] += lax.dot_general(
            x, x, TN, preferred_element_type=jnp.float32)
        # per-class assignment mass (lane reduction, f32) for the entropy term
        sum_ref[...] += jnp.sum(x.astype(jnp.float32), axis=1, keepdims=True)

    return kernel


def _make_finalize_kernel(class_num, temperature):
    """Turns the reduced (2C,2C) Gram + (2C,1) masses into the scalar loss."""
    C = class_num
    N2 = 2 * C
    inv_temp = 1.0 / float(temperature)

    def kernel(gram_ref, sum_ref, out_ref):
        gram = gram_ref[...]                                  # (2C, 2C) f32
        s = sum_ref[...]                                      # (2C, 1)  f32

        rows = lax.broadcasted_iota(jnp.int32, (N2, N2), 0)
        cols = lax.broadcasted_iota(jnp.int32, (N2, N2), 1)
        eye = rows == cols
        pos_mask = jnp.abs(rows - cols) == C                  # the (i, C+i)/(C+i, i) pairs

        # squared norms straight off the Gram diagonal, in both orientations
        # (no in-kernel transpose ever needed).
        diag = jnp.where(eye, gram, 0.0)
        d_c = jnp.sum(diag, axis=1, keepdims=True)            # (2C, 1)
        d_r = jnp.sum(diag, axis=0, keepdims=True)            # (1, 2C)
        # torch CosineSimilarity eps=1e-8 on the norm -> 1e-16 on the squared norm
        inv_c = lax.rsqrt(jnp.maximum(d_c, 1e-16))
        inv_r = lax.rsqrt(jnp.maximum(d_r, 1e-16))

        sim = gram * (inv_c * inv_r) * inv_temp               # cosine sim / temperature
        sim_m = jnp.where(eye, -1e30, sim)                    # self-similarity excluded

        # row-wise logsumexp over everything but the diagonal (the positive pair stays
        # in the logits, exactly as in the reference CrossEntropyLoss construction).
        m = jnp.max(sim_m, axis=1, keepdims=True)
        lse = m + jnp.log(jnp.sum(jnp.exp(sim_m - m), axis=1, keepdims=True))
        pos_sum = jnp.sum(jnp.where(pos_mask, sim, 0.0))
        ce = jnp.sum(lse) - pos_sum

        # entropy regularizer (same NaN-at-exactly-zero-class-mass behavior as PyTorch)
        half = lax.broadcasted_iota(jnp.int32, (N2, 1), 0) < C
        tot_i = jnp.sum(jnp.where(half, s, 0.0))
        tot_j = jnp.sum(jnp.where(half, 0.0, s))
        p = s / jnp.where(half, tot_i, tot_j)
        ne = 2.0 * math.log(C) + jnp.sum(p * jnp.log(p))

        out_ref[0, 0] = ce / N2 + ne

    return kernel


def cluster_loss(c_i, c_j, class_num, temperature, *, block_b=8192,
                 num_partitions=None):
    """Pallas implementation of ClusterLoss.forward(c_i, c_j).

    c_i, c_j: (batch, class_num) soft cluster assignments.
    """
    B, C = c_i.shape
    assert C == class_num and c_j.shape == (B, C)
    N2 = 2 * C

    # lane-dense class-major layout: rows = classes (i-half then j-half), lanes = batch
    x = jnp.concatenate([c_i.T, c_j.T], axis=0)               # (2C, B)

    if B <= block_b:
        P, nb, tb, Bp = 1, 1, B, B                             # whole batch in one tile
    else:
        tb = ((int(block_b) + 127) // 128) * 128               # lane-dim blocks must be /128
        if num_partitions is None:
            num_partitions = 2 if B >= 2 * tb else 1           # v7x: one partition per TC
        P = max(1, int(num_partitions))
        nb = pl.cdiv(pl.cdiv(B, P), tb)
        Bp = P * nb * tb
        if Bp != B:
            # zero columns contribute nothing to the Gram or the per-class sums
            x = jnp.pad(x, ((0, 0), (0, Bp - B)))

    itemsize = jnp.dtype(x.dtype).itemsize

    gram_parts, sum_parts = pl.pallas_call(
        _make_partial_kernel(C),
        out_shape=(jax.ShapeDtypeStruct((P, N2, N2), jnp.float32),
                   jax.ShapeDtypeStruct((P, N2, 1), jnp.float32)),
        grid_spec=pltpu.PrefetchScalarGridSpec(
            num_scalar_prefetch=0,
            grid=(P, nb),
            in_specs=[pl.BlockSpec((N2, tb), lambda p, b: (0, p * nb + b))],
            out_specs=(pl.BlockSpec((None, N2, N2), lambda p, b: (p, 0, 0)),
                       pl.BlockSpec((None, N2, 1), lambda p, b: (p, 0, 0)))),
        compiler_params=pltpu.CompilerParams(
            dimension_semantics=("parallel", "arbitrary")),
        cost_estimate=pl.CostEstimate(
            flops=2 * Bp * N2 * N2,
            transcendentals=0,
            bytes_accessed=Bp * N2 * itemsize + P * (N2 * N2 + N2) * 4),
    )(x)

    # tiny cross-partition reduction (P x 20 x 20 floats) in plain JAX
    gram = jnp.sum(gram_parts, axis=0)                         # (2C, 2C)
    sums = jnp.sum(sum_parts, axis=0)                          # (2C, 1)

    out = pl.pallas_call(
        _make_finalize_kernel(C, temperature),
        out_shape=jax.ShapeDtypeStruct((1, 1), jnp.float32),
        grid_spec=pltpu.PrefetchScalarGridSpec(
            num_scalar_prefetch=0,
            grid=(1,),
            in_specs=[pl.BlockSpec((N2, N2), lambda i: (0, 0)),
                      pl.BlockSpec((N2, 1), lambda i: (0, 0))],
            out_specs=pl.BlockSpec((1, 1), lambda i: (0, 0),
                                   memory_space=pltpu.MemorySpace.SMEM)),
        compiler_params=pltpu.CompilerParams(
            dimension_semantics=("arbitrary",)),
        cost_estimate=pl.CostEstimate(
            flops=10 * N2 * N2,
            transcendentals=N2 * N2 + 3 * N2,
            bytes_accessed=(N2 * N2 + N2) * 4 + 4),
    )(gram, sums)
    return out[0, 0]


def cluster_loss_ref(c_i, c_j, class_num, temperature):
    """Pure-JAX reference mirroring the PyTorch forward (for sanity check)."""
    p_i = jnp.sum(c_i, axis=0)
    p_i = p_i / jnp.sum(p_i)
    ne_i = math.log(class_num) + jnp.sum(p_i * jnp.log(p_i))
    p_j = jnp.sum(c_j, axis=0)
    p_j = p_j / jnp.sum(p_j)
    ne_j = math.log(class_num) + jnp.sum(p_j * jnp.log(p_j))

    N = 2 * class_num
    c = jnp.concatenate([c_i.T, c_j.T], axis=0)
    norm = jnp.maximum(jnp.linalg.norm(c, axis=1, keepdims=True), 1e-8)
    c_hat = c / norm
    sim = (c_hat @ c_hat.T) / temperature
    pos = jnp.concatenate(
        [jnp.diagonal(sim, class_num), jnp.diagonal(sim, -class_num)])
    sim_nd = jnp.where(jnp.eye(N, dtype=bool), -jnp.inf, sim)
    lse = jax.scipy.special.logsumexp(sim_nd, axis=1)
    loss = jnp.sum(lse - pos) / N
    return loss + ne_i + ne_j


if __name__ == "__main__":
    class_num = 10
    temperature = 0.5

    key = jax.random.PRNGKey(0)
    k1, k2, k3, k4 = jax.random.split(key, 4)

    # c_i, c_j are soft cluster assignments (rows sum to 1), shape (batch, class_num)
    B = 64
    c_i = jax.nn.softmax(jax.random.normal(k1, (B, class_num), jnp.float32), axis=1)
    c_j = jax.nn.softmax(jax.random.normal(k2, (B, class_num), jnp.float32), axis=1)
    ref = cluster_loss_ref(c_i, c_j, class_num, temperature)

    # 1) single-tile path (whole batch in one lane-dense block)
    out1 = jax.block_until_ready(cluster_loss(c_i, c_j, class_num, temperature))
    assert jnp.allclose(out1, ref, rtol=1e-4, atol=1e-4), (out1, ref)

    # 2) tiled + zero-padded + 2-partition (megacore-style) path
    out2 = jax.block_until_ready(
        cluster_loss(c_i, c_j, class_num, temperature, block_b=16, num_partitions=2))
    assert jnp.allclose(out2, ref, rtol=1e-4, atol=1e-4), (out2, ref)

    # 3) multi-step accumulation per partition (nb > 1) on a slightly larger batch
    B2 = 640
    ci2 = jax.nn.softmax(jax.random.normal(k3, (B2, class_num), jnp.float32), axis=1)
    cj2 = jax.nn.softmax(jax.random.normal(k4, (B2, class_num), jnp.float32), axis=1)
    ref2 = cluster_loss_ref(ci2, cj2, class_num, temperature)
    out3 = jax.block_until_ready(
        cluster_loss(ci2, cj2, class_num, temperature, block_b=128, num_partitions=2))
    assert jnp.allclose(out3, ref2, rtol=1e-4, atol=1e-4), (out3, ref2)

    print("KERNEL_OK")
</pallas_src>

<mosaic_0001>
module attributes {stable_mosaic.version = 11 : i64} {
  func.func @kernel(%arg0: i32, %arg1: i32, %arg2: memref<20x64xf32, #tpu.memory_space<vmem>>, %arg3: memref<1x20x20xf32, #tpu.memory_space<vmem>>, %arg4: memref<1x20x1xf32, #tpu.memory_space<vmem>>) attributes {dimension_semantics = [#tpu.dimension_semantics<parallel>, #tpu.dimension_semantics<arbitrary>], iteration_bounds = array<i64: 1, 1>, scalar_prefetch = 0 : i64, scratch_operands = 0 : i64, tpu.core_type = #tpu.core_type<tc>, window_params = [{transform_indices = @transform_0, window_bounds = array<i64: 20, 64>}, {transform_indices = @transform_1, window_bounds = array<i64: 1, 20, 20>}, {transform_indices = @transform_2, window_bounds = array<i64: 1, 20, 1>}]} {
    %c0_i32 = arith.constant 0 : i32
    %0 = arith.cmpi eq, %arg1, %c0_i32 : i32
    %1 = arith.extui %0 : i1 to i32
    %c0_i32_0 = arith.constant 0 : i32
    %2 = arith.cmpi ne, %1, %c0_i32_0 : i32
    scf.if %2 {
      %cst_15 = arith.constant 0.000000e+00 : f32
      %19 = vector.broadcast %cst_15 : f32 to vector<20x20xf32>
      %c0_16 = arith.constant 0 : index
      %c0_17 = arith.constant 0 : index
      %c0_18 = arith.constant 0 : index
      %20 = vector.load %arg3[%c0_16, %c0_17, %c0_18] : memref<1x20x20xf32, #tpu.memory_space<vmem>>, vector<1x20x20xf32>
      %21 = vector.shape_cast %20 : vector<1x20x20xf32> to vector<20x20xf32>
      %22 = vector.shape_cast %19 : vector<20x20xf32> to vector<1x20x20xf32>
      tpu.vector_store %arg3[%c0_16, %c0_17, %c0_18], %22 {strides = array<i32>} : memref<1x20x20xf32, #tpu.memory_space<vmem>>, vector<1x20x20xf32>,
      %cst_19 = arith.constant 0.000000e+00 : f32
      %23 = vector.broadcast %cst_19 : f32 to vector<20x1xf32>
      %c0_20 = arith.constant 0 : index
      %c0_21 = arith.constant 0 : index
      %c0_22 = arith.constant 0 : index
      %24 = vector.load %arg4[%c0_20, %c0_21, %c0_22] : memref<1x20x1xf32, #tpu.memory_space<vmem>>, vector<1x20x1xf32>
      %25 = vector.shape_cast %24 : vector<1x20x1xf32> to vector<20x1xf32>
      %26 = vector.shape_cast %23 : vector<20x1xf32> to vector<1x20x1xf32>
      tpu.vector_store %arg4[%c0_20, %c0_21, %c0_22], %26 {strides = array<i32>} : memref<1x20x1xf32, #tpu.memory_space<vmem>>, vector<1x20x1xf32>,
    } else {
    }
    %c0 = arith.constant 0 : index
    %c0_1 = arith.constant 0 : index
    %3 = vector.load %arg2[%c0, %c0_1] : memref<20x64xf32, #tpu.memory_space<vmem>>, vector<20x64xf32>
    %c0_2 = arith.constant 0 : index
    %c0_3 = arith.constant 0 : index
    %c0_4 = arith.constant 0 : index
    %4 = vector.load %arg3[%c0_2, %c0_3, %c0_4] : memref<1x20x20xf32, #tpu.memory_space<vmem>>, vector<1x20x20xf32>
    %5 = vector.shape_cast %4 : vector<1x20x20xf32> to vector<20x20xf32>
    %cst = arith.constant dense<0.000000e+00> : vector<20x20xf32>
    %6 = tpu.matmul %3, %3, %cst {dimension_numbers = #tpu.dot_dimension_numbers<[1], [1], [0], [0], [0, 0, 1, 0], [], []>} : vector<20x64xf32>, vector<20x64xf32>, vector<20x20xf32> -> vector<20x20xf32>
    %7 = arith.addf %5, %6 : vector<20x20xf32>
    %c0_5 = arith.constant 0 : index
    %c0_6 = arith.constant 0 : index
    %c0_7 = arith.constant 0 : index
    %8 = vector.load %arg3[%c0_5, %c0_6, %c0_7] : memref<1x20x20xf32, #tpu.memory_space<vmem>>, vector<1x20x20xf32>
    %9 = vector.shape_cast %8 : vector<1x20x20xf32> to vector<20x20xf32>
    %10 = vector.shape_cast %7 : vector<20x20xf32> to vector<1x20x20xf32>
    tpu.vector_store %arg3[%c0_5, %c0_6, %c0_7], %10 {strides = array<i32>} : memref<1x20x20xf32, #tpu.memory_space<vmem>>, vector<1x20x20xf32>,
    %c0_8 = arith.constant 0 : index
    %c0_9 = arith.constant 0 : index
    %c0_10 = arith.constant 0 : index
    %11 = vector.load %arg4[%c0_8, %c0_9, %c0_10] : memref<1x20x1xf32, #tpu.memory_space<vmem>>, vector<1x20x1xf32>
    %12 = vector.shape_cast %11 : vector<1x20x1xf32> to vector<20x1xf32>
    %cst_11 = arith.constant dense<0.000000e+00> : vector<20xf32>
    %13 = vector.multi_reduction <add>, %3, %cst_11 [1] : vector<20x64xf32> to vector<20xf32>
    %14 = vector.shape_cast %13 : vector<20xf32> to vector<20x1xf32>
    %15 = arith.addf %12, %14 : vector<20x1xf32>
    %c0_12 = arith.constant 0 : index
    %c0_13 = arith.constant 0 : index
    %c0_14 = arith.constant 0 : index
    %16 = vector.load %arg4[%c0_12, %c0_13, %c0_14] : memref<1x20x1xf32, #tpu.memory_space<vmem>>, vector<1x20x1xf32>
    %17 = vector.shape_cast %16 : vector<1x20x1xf32> to vector<20x1xf32>
    %18 = vector.shape_cast %15 : vector<20x1xf32> to vector<1x20x1xf32>
    tpu.vector_store %arg4[%c0_12, %c0_13, %c0_14], %18 {strides = array<i32>} : memref<1x20x1xf32, #tpu.memory_space<vmem>>, vector<1x20x1xf32>,
    return
  }
  func.func @transform_0(%arg0: i32, %arg1: i32) -> (i32, i32) {
    %c1_i32 = arith.constant 1 : i32
    %0 = arith.muli %arg0, %c1_i32 : i32
    %1 = arith.addi %0, %arg1 : i32
    %c0_i32 = arith.constant 0 : i32
    %c0_i32_0 = arith.constant 0 : i32
    return %c0_i32, %1 : i32, i32
  }
  func.func @transform_1(%arg0: i32, %arg1: i32) -> (i32, i32, i32) {
    %c0_i32 = arith.constant 0 : i32
    %c0_i32_0 = arith.constant 0 : i32
    %c0_i32_1 = arith.constant 0 : i32
    return %arg0, %c0_i32, %c0_i32_0 : i32, i32, i32
  }
  func.func @transform_2(%arg0: i32, %arg1: i32) -> (i32, i32, i32) {
    %c0_i32 = arith.constant 0 : i32
    %c0_i32_0 = arith.constant 0 : i32
    %c0_i32_1 = arith.constant 0 : i32
    return %arg0, %c0_i32, %c0_i32_0 : i32, i32, i32
  }
}

</mosaic_0001>

<bundles_post_ra>
// kernel: tpu_custom_call.1
= control target key start
LH: loop header
LB: loop body
LE: loop exit
PB: predicated region body
PF: predicated region fallthrough
CT: control target
= control target key end

     0   :  { %8 = vsyncpa [#allocation3], 0  ;;  %s241_s9 = smov [#allocation2]   ;;  %s350_s0 = inlined_call_operand.hbm [shape: f32[20,64], index: 0, kind: input, shape index: {}]   ;;  %s351_s1 = inlined_call_operand.vmem [shape: f32[1,20,20], index: 1, kind: output, shape index: {0}]   ;;  %s352_s2 = inlined_call_operand.vmem [shape: f32[1,20,1], index: 2, kind: output, shape index: {1}]  }
   0x1   :  { %s17_s10 = sshll.u32 %s241_s9, 4  ;;  %s217_s13 = scalar_lea.hbm %s350_s0, 384  ;;  %s18_s10 = int_to_ptr.vmem [resolvable:$true] %s17_s10 }
   0x2   :  { %p218_p0 = scmp.ne.s32.totalorder %s350_s0, %s217_s13  ;;  %p221_p1 = scmp.lt.u32.totalorder %s217_s13, %s350_s0 }
   0x4   :  { %p223_p2 = pnand %p221_p1, %p218_p0 }
   0x6   :  { %226 = shalt.err (!%p223_p2)
}
   0x7   :  { %s227_s18 = scalar_lea.vmem %s18_s10, 384  ;;  %p232_p4 = scmp.lt.s32.totalorder %s18_s10, %s18_s10 }
   0x8   :  { %p228_p3 = scmp.ne.s32.totalorder %s18_s10, %s227_s18  ;;  %p233_p5 = scmp.lt.s32.totalorder %s227_s18, %s227_s18 }
   0xa   :  { %p234_p6 = por %p233_p5, %p232_p4 }
   0xc   :  { %p235_p7 = pnand %p234_p6, %p228_p3 }
   0xe   :  { %238 = shalt.err (!%p235_p7)
}
   0xf   :  { %s242_s19 = smov 128   ;;  %s243_s20 = smov 8  }
  0x10   :  { %23 = dma.hbm_to_vmem [thread:$0]  %s350_s0, 384, %s18_s10, [#allocation3], %s242_s19, %s242_s19, %s243_s20  }
  0x11   :  { %239 = dma.done.wait [#allocation3], 384  }
  0x12   :  { %240 = vsyncadd [#allocation3], 4294966912  ;;  %v244_v0 = vmov 0.0|0.0   ;;  %vm37_vm0 = vcmask 7168   ;;  %vm245_vm1 = vmmov 0   ;;  %v246_v1 = vmov 0.0  }
  0x13   :  { %207 = vmatprep.subr.bf16.mxu1 %v244_v0  ;;  %203 = vmatprep.subr.bf16.mxu0 %v244_v0  ;;  %38 = vst.msk [vmem:[%s352_s2] sm:$0xff] %vm37_vm0, %v246_v1  ;;  %39 = vst.msk [vmem:[%s352_s2 + $0x8] sm:$0xff] %vm37_vm0, %v246_v1  ;;  %vm48_vm2 = vcmask 523264   ;;  %vm155_vm3 = vcmask 519168   ;;  %v42_v2 = vld [vmem:[#allocation2] sm:$0xff]  ;;  %v43_v3 = vld [vmem:[#allocation2 + $0x8] sm:$0xff] }
  0x14   :  { %197 = vmatprep.mubr.msk.f32.mxu1 %vm245_vm1, %v246_v1  ;;  %194 = vmatprep.mubr.msk.f32.mxu0 %vm245_vm1, %v246_v1  ;;  %vm205_vm4 = vmpackc.low %vm48_vm2, %vm48_vm2  ;;  %v44_v4 = vld [vmem:[#allocation2 + $0x10] sm:$0xf]  ;;  %v204_v5 = vpack.c.bf16 %v43_v3, %v42_v2  ;;  %v149_v6 = vsel %vm48_vm2, %v42_v2, 0.0  ;;  %v152_v8 = vsel %vm48_vm2, %v43_v3, 0.0  ;;  %vm32_vm5 = vcmask 162816  }
  0x15   :  { %v156_v7 = vsel %vm155_vm3, %v44_v4, 0.0  ;;  %150 = vadd.xlane.f32.xlu0 %v149_v6  ;;  %34 = vst.msk [vmem:[%s351_s1 + $0x8] sm:$0xff] %vm32_vm5, %v246_v1  ;;  %33 = vst.msk [vmem:[%s351_s1] sm:$0xff] %vm32_vm5, %v246_v1  ;;  %vm40_vm6 = vcmask 3072   ;;  %vm35_vm7 = vcmask 158720  }
  0x16   :  { %157 = vadd.xlane.f32.xlu1 %v156_v7  ;;  %209 = vmatpush3.bf16.xpose.msk.msra.mxu1 %vm205_vm4, %v204_v5  ;;  %41 = vst.msk [vmem:[%s352_s2 + $0x10] sm:$0xf] %vm40_vm6, %v246_v1 }
  0x17   :  { %206 = vmatpush3.bf16.xpose.msk.msra.mxu0 %vm205_vm4, %v204_v5  ;;  %208 = vmatprep.subr.mxu1 %v246_v1  ;;  %36 = vst.msk [vmem:[%s351_s1 + $0x10] sm:$0xf] %vm35_vm7, %v246_v1 }
  0x18   :  { %192 = vmatprep.subr.mxu0 %v246_v1 }
  0x19   :  { %153 = vadd.xlane.f32.xlu0 %v152_v8 }
  0x1a   :  { %v146_v9 = vld [vmem:[%s352_s2] sm:$0xff]  ;;  %v147_v15 = vld [vmem:[%s352_s2 + $0x8] sm:$0xff] }
  0x1c   :  { %v46_v18 = vld [vmem:[%s351_s1 + $0x8] sm:$0xff]  ;;  %v45_v19 = vld [vmem:[%s351_s1] sm:$0xff] }
  0x1d   :  { %v148_v10 = vld [vmem:[%s352_s2 + $0x10] sm:$0xf] }
  0x1e   :  { %210 = vmatpush3.xpose.msk.msra.mxu1 %vm48_vm2, %v44_v4  ;;  %v47_v26 = vld [vmem:[%s351_s1 + $0x10] sm:$0xf] }
  0x1f   :  { %193 = vmatpush3.xpose.msk.msra.mxu0 %vm48_vm2, %v44_v4 }
  0x21   :  { %198 = vmatmul.mubr.msk.f32.vlgmr.msra.gmra.mrb[0].mxu1 %vm48_vm2, %v43_v3 }
  0x22   :  { %195 = vmatmul.mubr.msk.f32.vlgmr.msra.gmra.mrb[0].mxu0 %vm48_vm2, %v42_v2  ;;  %200 = vmatprep.mubr.msk.f32.mxu1 %vm245_vm1, %v246_v1 }
  0x25   :  { %201 = vmatmul.mubr.msk.f32.gmra.mrb[2].mxu1 %vm48_vm2, %v44_v4 }
  0xa2   :  { %v151_v11 = vpop.xlane.xlu0 %150 }
  0xa3   :  { %v158_v12 = vpop.xlane.xlu1 %157  ;;  %v159_v13 = vadd.f32 %v151_v11, %v146_v9 }
  0xa4   :  { %v161_v14 = vadd.f32 %v158_v12, %v148_v10 }
  0xa5   :  { %163 = vst.msk [vmem:[%s352_s2] sm:$0xff] %vm37_vm0, %v159_v13 }
  0xa6   :  { %166 = vst.msk [vmem:[%s352_s2 + $0x10] sm:$0xf] %vm40_vm6, %v161_v14  ;;  %v154_v16 = vpop.xlane.xlu0 %153 }
  0xa7   :  { %v160_v17 = vadd.f32 %v154_v16, %v147_v15 }
  0xa9   :  { %164 = vst.msk [vmem:[%s352_s2 + $0x8] sm:$0xff] %vm37_vm0, %v160_v17 }
  0xf4   :  { %v129_v20 = vpop.f32.mrb[0].mxu1 }
  0xf5   :  { %v124_v21 = vpop.f32.mrb[0].mxu0  ;;  %v139_v22 = vadd.f32 %v129_v20, %v46_v18  ;;  %v199_v23 = vpop.f32.mrb[1].mxu1 }
  0xf6   :  { %v138_v24 = vadd.f32 %v124_v21, %v45_v19  ;;  %v196_v25 = vpop.f32.mrb[1].mxu0 }
  0xf7   :  { %143 = vst.msk [vmem:[%s351_s1 + $0x8] sm:$0xff] %vm32_vm5, %v139_v22 }
  0xf8   :  { %142 = vst.msk [vmem:[%s351_s1] sm:$0xff] %vm32_vm5, %v138_v24  ;;  %v134_v27 = vpop.f32.mrb[2].mxu1 }
  0xf9   :  { %v140_v28 = vadd.f32 %v134_v27, %v47_v26  ;;  %v202_v29 = vpop.f32.mrb[3].mxu1 }
  0xfb   :  { %145 = vst.msk [vmem:[%s351_s1 + $0x10] sm:$0xf] %vm35_vm7, %v140_v28 }
  0xfc   :  { %175 = vsyncpa [#allocation3], 1 }

</bundles_post_ra>
